<compile_context>
chip_gen: v5e
topology: v5e:2x2
jax: 0.10.0
libtpu: 0.0.40
codegen_flags: <defaults>
</compile_context>

<pallas_src>
import math

import jax
import jax.numpy as jnp
from jax.experimental import pallas as pl
from jax.experimental.pallas import tpu as pltpu


def _round_up(x, m):
    return ((x + m - 1) // m) * m


def _cdiv(a, b):
    return -(-a // b)


_TRAFFIC_CAP_BYTES = 2 * 1024 * 1024   # ~1-4 MB/tile already hits HBM roofline
_MIN_TOTAL_STEPS = 8                   # keep the pipeline busy / feed 2 TCs (v7x)


# ---------------------------------------------------------------------------
# Kernels
# ---------------------------------------------------------------------------

def _outconv_fma_kernel(x_ref, w_ref, b_ref, o_ref):
    """Small-channel path: scalar-operand VPU FMA chain on dense (S,128) slabs.

    x_ref: VMEM (Cin, S, 128)    -- HW folded into sublane(S) x lane(128)
    w_ref: SMEM (Cout, Cin) f32  -- scalar reads -> scalar*vector broadcasts
    b_ref: SMEM (Cout,)     f32
    o_ref: VMEM (Cout, S, 128)   -- full, unmasked lane/sublane-dense stores
    """
    cin = x_ref.shape[0]
    cout = o_ref.shape[0]
    slab = x_ref.shape[1:]
    for co in range(cout):                      # static unroll (bounded by dispatcher)
        acc = jnp.full(slab, b_ref[co], dtype=jnp.float32)
        for ci in range(cin):
            # Cast one channel slab at a time: keeps live f32 temporaries to
            # ~2 slabs instead of upcasting the whole (Cin,S,128) tile.
            acc = acc + w_ref[co, ci] * x_ref[ci].astype(jnp.float32)
        o_ref[co] = acc.astype(o_ref.dtype)


def _outconv_dot_kernel(x_ref, w_ref, b_ref, o_ref):
    """General path: MXU matmul, f32 accumulator, bias added before downcast.

    x_ref: VMEM (Cin, T), w_ref: VMEM (Cout, Cin), b_ref: VMEM (Cout, 1),
    o_ref: VMEM (Cout, T)
    """
    acc = jnp.dot(w_ref[...], x_ref[...], preferred_element_type=jnp.float32)
    o_ref[...] = (acc + b_ref[...].astype(jnp.float32)).astype(o_ref.dtype)


# ---------------------------------------------------------------------------
# Tile selection (padding-aware VMEM accounting)
# ---------------------------------------------------------------------------

def _pick_tile_s(hwb, cin, cout, n, dtype_bytes, sub, vmem_budget_bytes):
    """Sublane-row tile for the (Cin,S,128)/(Cout,S,128) FMA layout."""
    # Per sublane-row (128 lanes): double-buffered x+out blocks (no sublane
    # padding -- channels sit on the major axis) + ~2 live f32 slabs in-kernel
    # (accumulator + upcast channel).
    per_s = 128 * (2 * (cin + cout) * dtype_bytes + 2 * 4)
    max_s = max(vmem_budget_bytes // per_s, sub)
    cap_traffic = max(_TRAFFIC_CAP_BYTES // (128 * (cin + cout) * dtype_bytes), sub)
    cap_steps = max(_cdiv(hwb, _cdiv(_MIN_TOTAL_STEPS, n)), 1)
    s = min(max_s, cap_traffic, cap_steps, hwb)
    if s >= hwb:
        return hwb                              # full extent: exempt from x`sub` rule
    s = max(sub, (s // sub) * sub)              # (S,128) blocks must be sublane-aligned
    return min(s, hwb)


def _pick_tile_hw(hw, cin, cout, n, dtype_bytes, vmem_budget_bytes):
    """Lane tile for the (Cin,T)/(Cout,T) MXU layout, sublane-padding aware."""
    sub = (8 * 4) // dtype_bytes                # sublanes per packed (sub,128) tile
    cin_p = _round_up(cin, sub)
    cout_p = _round_up(cout, sub)
    # Resident weight/bias blocks, padded to (sub,128) tiles, x2 buffers.
    resident = 2 * dtype_bytes * (cout_p * _round_up(cin, 128) + cout_p * 128)
    # Per lane column: double-buffered x+out blocks (sublane-padded) + the
    # in-kernel f32 accumulator of the dot.
    per_t = 2 * dtype_bytes * (cin_p + cout_p) + 4 * _round_up(cout, 8)
    avail = max(vmem_budget_bytes - resident, 0)
    # NOTE: the 128-lane floor can only exceed the budget when the weights
    # alone overflow it (pathological Cin*Cout); no smaller legal tile exists.
    max_t = max(avail // per_t, 128)
    cap_traffic = max(_TRAFFIC_CAP_BYTES // (dtype_bytes * (cin + cout)), 128)
    cap_steps = max(_cdiv(hw, _cdiv(_MIN_TOTAL_STEPS, n)), 1)
    t = min(max_t, cap_traffic, cap_steps, hw)
    if t >= hw:
        return hw
    t = max(128, (t // 128) * 128)              # lane tiles must be x128 (or full extent)
    return hw if t >= hw else t


# ---------------------------------------------------------------------------
# Wrappers
# ---------------------------------------------------------------------------

def _out_conv_fma(x_nchw, weight, bias, tile_s, vmem_budget_bytes):
    N, Cin, H, W = x_nchw.shape
    Cout = weight.shape[0]
    HW = H * W
    HWb = HW // 128
    dtype_bytes = jnp.dtype(x_nchw.dtype).itemsize
    sub = (8 * 4) // dtype_bytes

    # Pure reshapes: no transposes, no extra HBM round trips.
    x = x_nchw.reshape(N, Cin, HWb, 128)
    w = weight.reshape(Cout, Cin).astype(jnp.float32)   # tiny; lives in SMEM
    b = bias.reshape(Cout).astype(jnp.float32)

    if tile_s is None:
        tile_s = _pick_tile_s(HWb, Cin, Cout, N, dtype_bytes, sub, vmem_budget_bytes)
    grid = (N, _cdiv(HWb, tile_s))

    cost = pl.CostEstimate(
        flops=2 * N * HW * Cin * Cout,
        transcendentals=0,
        bytes_accessed=dtype_bytes * N * HW * (Cin + Cout) + 4 * (Cin * Cout + Cout),
    )

    out = pl.pallas_call(
        _outconv_fma_kernel,
        out_shape=jax.ShapeDtypeStruct((N, Cout, HWb, 128), x_nchw.dtype),
        grid=grid,
        in_specs=[
            # x: one batch plane, one (S,128) HW slab per step (batch squeezed).
            pl.BlockSpec((None, Cin, tile_s, 128), lambda n, t: (n, 0, t, 0)),
            # weight / bias: whole arrays in SMEM (scalar operands for the VPU).
            pl.BlockSpec(memory_space=pltpu.MemorySpace.SMEM),
            pl.BlockSpec(memory_space=pltpu.MemorySpace.SMEM),
        ],
        out_specs=pl.BlockSpec((None, Cout, tile_s, 128), lambda n, t: (n, 0, t, 0)),
        compiler_params=pltpu.CompilerParams(
            dimension_semantics=("parallel", "parallel")),
        cost_estimate=cost,
    )(x, w, b)
    return out.reshape(N, Cout, H, W)


def _out_conv_dot(x_nchw, weight, bias, tile_hw, vmem_budget_bytes):
    N, Cin, H, W = x_nchw.shape
    Cout = weight.shape[0]
    HW = H * W
    dtype_bytes = jnp.dtype(x_nchw.dtype).itemsize

    x = x_nchw.reshape(N, Cin, HW)
    w = weight.reshape(Cout, Cin)
    b = bias.reshape(Cout, 1)

    if tile_hw is None:
        tile_hw = _pick_tile_hw(HW, Cin, Cout, N, dtype_bytes, vmem_budget_bytes)
    grid = (N, _cdiv(HW, tile_hw))

    cost = pl.CostEstimate(
        flops=2 * N * HW * Cin * Cout,
        transcendentals=0,
        bytes_accessed=dtype_bytes * (N * HW * (Cin + Cout) + Cin * Cout + Cout),
    )

    out = pl.pallas_call(
        _outconv_dot_kernel,
        out_shape=jax.ShapeDtypeStruct((N, Cout, HW), x_nchw.dtype),
        grid=grid,
        in_specs=[
            pl.BlockSpec((None, Cin, tile_hw), lambda n, t: (n, 0, t)),
            # weight / bias: resident VMEM tiles for the whole grid.
            pl.BlockSpec((Cout, Cin), lambda n, t: (0, 0)),
            pl.BlockSpec((Cout, 1), lambda n, t: (0, 0)),
        ],
        out_specs=pl.BlockSpec((None, Cout, tile_hw), lambda n, t: (n, 0, t)),
        compiler_params=pltpu.CompilerParams(
            dimension_semantics=("parallel", "parallel")),
        cost_estimate=cost,
    )(x, w, b)
    return out.reshape(N, Cout, H, W)


def out_conv(x_nchw, weight, bias, *, tile=None, vmem_budget_bytes=8 * 1024 * 1024):
    """1x1 Conv2d forward (PyTorch OutConv semantics).

    x_nchw: (N, Cin, H, W); weight: (Cout, Cin, 1, 1); bias: (Cout,)
    returns (N, Cout, H, W).

    `tile` overrides the auto tile: sublane rows for the small-channel FMA
    path, lanes (multiple of 128) for the MXU path.  8 MiB default budget
    keeps the double-buffered working set well under every chip's scoped
    VMEM (v5e 16 MiB, v6e/v7x 32 MiB).
    """
    N, Cin, H, W = x_nchw.shape
    Cout = weight.shape[0]
    HW = H * W
    # Typical OutConv (Cin~64, Cout=num_classes) stays on the VPU: an MXU dot
    # with M=Cout<=16 uses <2% of the array and only adds MXU push/pop latency
    # to an HBM-bound kernel.  The Cin*Cout cap bounds the static FMA unroll.
    # HW not a multiple of 128 falls back to the general lane-tiled dot path.
    use_fma = (min(Cin, Cout) <= 16) and (Cin * Cout <= 2048) and (HW % 128 == 0)
    if use_fma:
        return _out_conv_fma(x_nchw, weight, bias, tile, vmem_budget_bytes)
    return _out_conv_dot(x_nchw, weight, bias, tile, vmem_budget_bytes)


# ---------------------------------------------------------------------------
# Init + reference + smoke tests
# ---------------------------------------------------------------------------

def init_outconv_params(key, in_channels, out_channels, dtype=jnp.float32):
    """Deterministic init mimicking nn.Conv2d defaults (kaiming-uniform-ish)."""
    k_w, k_b = jax.random.split(key)
    bound = 1.0 / math.sqrt(in_channels)
    weight = jax.random.uniform(
        k_w, (out_channels, in_channels, 1, 1), dtype, -bound, bound)
    bias = jax.random.uniform(k_b, (out_channels,), dtype, -bound, bound)
    return weight, bias


def _ref_outconv(x, weight, bias):
    Cout, Cin = weight.shape[0], weight.shape[1]
    return (jnp.einsum("nchw,oc->nohw", x, weight.reshape(Cout, Cin))
            + bias.reshape(1, Cout, 1, 1))


if __name__ == "__main__":
    key = jax.random.PRNGKey(0)

    # 1) Canonical small OutConv: FMA path, whole (HWb,128) plane per step.
    k1, k2, key = jax.random.split(key, 3)
    x = jax.random.normal(k1, (2, 4, 16, 16), jnp.float32)
    w, b = init_outconv_params(k2, 4, 3)
    out = jax.block_until_ready(out_conv(x, w, b))
    assert out.shape == (2, 3, 16, 16)
    assert jnp.allclose(out, _ref_outconv(x, w, b), atol=1e-5, rtol=1e-5)

    # 2) FMA path with a multi-tile HW grid (HWb=32 -> four (8,128) slabs).
    k1, k2, key = jax.random.split(key, 3)
    x = jax.random.normal(k1, (1, 4, 64, 64), jnp.float32)
    w, b = init_outconv_params(k2, 4, 3)
    out = jax.block_until_ready(out_conv(x, w, b))
    assert jnp.allclose(out, _ref_outconv(x, w, b), atol=1e-5, rtol=1e-5)

    # 3) Larger channel counts: MXU dot path, multi-tile lane grid.
    k1, k2, key = jax.random.split(key, 3)
    x = jax.random.normal(k1, (1, 32, 16, 16), jnp.float32)
    w, b = init_outconv_params(k2, 32, 24)
    out = jax.block_until_ready(out_conv(x, w, b))
    assert jnp.allclose(out, _ref_outconv(x, w, b), atol=1e-2, rtol=1e-2)

    # 4) HW not a multiple of 128: full-extent dot fallback.
    k1, k2, key = jax.random.split(key, 3)
    x = jax.random.normal(k1, (1, 4, 10, 10), jnp.float32)
    w, b = init_outconv_params(k2, 4, 3)
    out = jax.block_until_ready(out_conv(x, w, b))
    assert jnp.allclose(out, _ref_outconv(x, w, b), atol=1e-2, rtol=1e-2)

    print("KERNEL_OK")
</pallas_src>

<mosaic_0001>
module attributes {stable_mosaic.version = 11 : i64} {
  func.func @_outconv_fma_kernel(%arg0: i32, %arg1: i32, %arg2: memref<1x4x2x128xf32, #tpu.memory_space<vmem>>, %arg3: memref<3x4xf32, #tpu.memory_space<smem>>, %arg4: memref<3xf32, #tpu.memory_space<smem>>, %arg5: memref<1x3x2x128xf32, #tpu.memory_space<vmem>>) attributes {dimension_semantics = [#tpu.dimension_semantics<parallel>, #tpu.dimension_semantics<parallel>], iteration_bounds = array<i64: 2, 1>, scalar_prefetch = 0 : i64, scratch_operands = 0 : i64, tpu.core_type = #tpu.core_type<tc>, window_params = [{transform_indices = @transform_0, window_bounds = array<i64: 1, 4, 2, 128>}, {transform_indices = @transform_1, window_bounds = array<i64: 3, 4>}, {transform_indices = @transform_2, window_bounds = array<i64: 3>}, {transform_indices = @transform_3, window_bounds = array<i64: 1, 3, 2, 128>}]} {
    %c0 = arith.constant 0 : index
    %0 = memref.load %arg4[%c0] : memref<3xf32, #tpu.memory_space<smem>>
    %1 = vector.broadcast %0 : f32 to vector<2x128xf32>
    %c0_0 = arith.constant 0 : index
    %c0_1 = arith.constant 0 : index
    %2 = memref.load %arg3[%c0_0, %c0_1] : memref<3x4xf32, #tpu.memory_space<smem>>
    %c0_2 = arith.constant 0 : index
    %c0_3 = arith.constant 0 : index
    %c0_4 = arith.constant 0 : index
    %c0_5 = arith.constant 0 : index
    %3 = vector.load %arg2[%c0_2, %c0_3, %c0_4, %c0_5] : memref<1x4x2x128xf32, #tpu.memory_space<vmem>>, vector<1x1x2x128xf32>
    %4 = vector.shape_cast %3 : vector<1x1x2x128xf32> to vector<2x128xf32>
    %5 = vector.broadcast %2 : f32 to vector<2x128xf32>
    %6 = arith.mulf %5, %4 : vector<2x128xf32>
    %7 = arith.addf %1, %6 : vector<2x128xf32>
    %c0_6 = arith.constant 0 : index
    %c1 = arith.constant 1 : index
    %8 = memref.load %arg3[%c0_6, %c1] : memref<3x4xf32, #tpu.memory_space<smem>>
    %c0_7 = arith.constant 0 : index
    %c1_8 = arith.constant 1 : index
    %c0_9 = arith.constant 0 : index
    %c0_10 = arith.constant 0 : index
    %9 = vector.load %arg2[%c0_7, %c1_8, %c0_9, %c0_10] : memref<1x4x2x128xf32, #tpu.memory_space<vmem>>, vector<1x1x2x128xf32>
    %10 = vector.shape_cast %9 : vector<1x1x2x128xf32> to vector<2x128xf32>
    %11 = vector.broadcast %8 : f32 to vector<2x128xf32>
    %12 = arith.mulf %11, %10 : vector<2x128xf32>
    %13 = arith.addf %7, %12 : vector<2x128xf32>
    %c0_11 = arith.constant 0 : index
    %c2 = arith.constant 2 : index
    %14 = memref.load %arg3[%c0_11, %c2] : memref<3x4xf32, #tpu.memory_space<smem>>
    %c0_12 = arith.constant 0 : index
    %c2_13 = arith.constant 2 : index
    %c0_14 = arith.constant 0 : index
    %c0_15 = arith.constant 0 : index
    %15 = vector.load %arg2[%c0_12, %c2_13, %c0_14, %c0_15] : memref<1x4x2x128xf32, #tpu.memory_space<vmem>>, vector<1x1x2x128xf32>
    %16 = vector.shape_cast %15 : vector<1x1x2x128xf32> to vector<2x128xf32>
    %17 = vector.broadcast %14 : f32 to vector<2x128xf32>
    %18 = arith.mulf %17, %16 : vector<2x128xf32>
    %19 = arith.addf %13, %18 : vector<2x128xf32>
    %c0_16 = arith.constant 0 : index
    %c3 = arith.constant 3 : index
    %20 = memref.load %arg3[%c0_16, %c3] : memref<3x4xf32, #tpu.memory_space<smem>>
    %c0_17 = arith.constant 0 : index
    %c3_18 = arith.constant 3 : index
    %c0_19 = arith.constant 0 : index
    %c0_20 = arith.constant 0 : index
    %21 = vector.load %arg2[%c0_17, %c3_18, %c0_19, %c0_20] : memref<1x4x2x128xf32, #tpu.memory_space<vmem>>, vector<1x1x2x128xf32>
    %22 = vector.shape_cast %21 : vector<1x1x2x128xf32> to vector<2x128xf32>
    %23 = vector.broadcast %20 : f32 to vector<2x128xf32>
    %24 = arith.mulf %23, %22 : vector<2x128xf32>
    %25 = arith.addf %19, %24 : vector<2x128xf32>
    %c0_21 = arith.constant 0 : index
    %c0_22 = arith.constant 0 : index
    %c0_23 = arith.constant 0 : index
    %c0_24 = arith.constant 0 : index
    %26 = vector.load %arg5[%c0_21, %c0_22, %c0_23, %c0_24] : memref<1x3x2x128xf32, #tpu.memory_space<vmem>>, vector<1x1x2x128xf32>
    %27 = vector.shape_cast %26 : vector<1x1x2x128xf32> to vector<2x128xf32>
    %28 = vector.shape_cast %25 : vector<2x128xf32> to vector<1x1x2x128xf32>
    tpu.vector_store %arg5[%c0_21, %c0_22, %c0_23, %c0_24], %28 {strides = array<i32>} : memref<1x3x2x128xf32, #tpu.memory_space<vmem>>, vector<1x1x2x128xf32>,
    %c1_25 = arith.constant 1 : index
    %29 = memref.load %arg4[%c1_25] : memref<3xf32, #tpu.memory_space<smem>>
    %30 = vector.broadcast %29 : f32 to vector<2x128xf32>
    %c1_26 = arith.constant 1 : index
    %c0_27 = arith.constant 0 : index
    %31 = memref.load %arg3[%c1_26, %c0_27] : memref<3x4xf32, #tpu.memory_space<smem>>
    %c0_28 = arith.constant 0 : index
    %c0_29 = arith.constant 0 : index
    %c0_30 = arith.constant 0 : index
    %c0_31 = arith.constant 0 : index
    %32 = vector.load %arg2[%c0_28, %c0_29, %c0_30, %c0_31] : memref<1x4x2x128xf32, #tpu.memory_space<vmem>>, vector<1x1x2x128xf32>
    %33 = vector.shape_cast %32 : vector<1x1x2x128xf32> to vector<2x128xf32>
    %34 = vector.broadcast %31 : f32 to vector<2x128xf32>
    %35 = arith.mulf %34, %33 : vector<2x128xf32>
    %36 = arith.addf %30, %35 : vector<2x128xf32>
    %c1_32 = arith.constant 1 : index
    %c1_33 = arith.constant 1 : index
    %37 = memref.load %arg3[%c1_32, %c1_33] : memref<3x4xf32, #tpu.memory_space<smem>>
    %c0_34 = arith.constant 0 : index
    %c1_35 = arith.constant 1 : index
    %c0_36 = arith.constant 0 : index
    %c0_37 = arith.constant 0 : index
    %38 = vector.load %arg2[%c0_34, %c1_35, %c0_36, %c0_37] : memref<1x4x2x128xf32, #tpu.memory_space<vmem>>, vector<1x1x2x128xf32>
    %39 = vector.shape_cast %38 : vector<1x1x2x128xf32> to vector<2x128xf32>
    %40 = vector.broadcast %37 : f32 to vector<2x128xf32>
    %41 = arith.mulf %40, %39 : vector<2x128xf32>
    %42 = arith.addf %36, %41 : vector<2x128xf32>
    %c1_38 = arith.constant 1 : index
    %c2_39 = arith.constant 2 : index
    %43 = memref.load %arg3[%c1_38, %c2_39] : memref<3x4xf32, #tpu.memory_space<smem>>
    %c0_40 = arith.constant 0 : index
    %c2_41 = arith.constant 2 : index
    %c0_42 = arith.constant 0 : index
    %c0_43 = arith.constant 0 : index
    %44 = vector.load %arg2[%c0_40, %c2_41, %c0_42, %c0_43] : memref<1x4x2x128xf32, #tpu.memory_space<vmem>>, vector<1x1x2x128xf32>
    %45 = vector.shape_cast %44 : vector<1x1x2x128xf32> to vector<2x128xf32>
    %46 = vector.broadcast %43 : f32 to vector<2x128xf32>
    %47 = arith.mulf %46, %45 : vector<2x128xf32>
    %48 = arith.addf %42, %47 : vector<2x128xf32>
    %c1_44 = arith.constant 1 : index
    %c3_45 = arith.constant 3 : index
    %49 = memref.load %arg3[%c1_44, %c3_45] : memref<3x4xf32, #tpu.memory_space<smem>>
    %c0_46 = arith.constant 0 : index
    %c3_47 = arith.constant 3 : index
    %c0_48 = arith.constant 0 : index
    %c0_49 = arith.constant 0 : index
    %50 = vector.load %arg2[%c0_46, %c3_47, %c0_48, %c0_49] : memref<1x4x2x128xf32, #tpu.memory_space<vmem>>, vector<1x1x2x128xf32>
    %51 = vector.shape_cast %50 : vector<1x1x2x128xf32> to vector<2x128xf32>
    %52 = vector.broadcast %49 : f32 to vector<2x128xf32>
    %53 = arith.mulf %52, %51 : vector<2x128xf32>
    %54 = arith.addf %48, %53 : vector<2x128xf32>
    %c0_50 = arith.constant 0 : index
    %c1_51 = arith.constant 1 : index
    %c0_52 = arith.constant 0 : index
    %c0_53 = arith.constant 0 : index
    %55 = vector.load %arg5[%c0_50, %c1_51, %c0_52, %c0_53] : memref<1x3x2x128xf32, #tpu.memory_space<vmem>>, vector<1x1x2x128xf32>
    %56 = vector.shape_cast %55 : vector<1x1x2x128xf32> to vector<2x128xf32>
    %57 = vector.shape_cast %54 : vector<2x128xf32> to vector<1x1x2x128xf32>
    tpu.vector_store %arg5[%c0_50, %c1_51, %c0_52, %c0_53], %57 {strides = array<i32>} : memref<1x3x2x128xf32, #tpu.memory_space<vmem>>, vector<1x1x2x128xf32>,
    %c2_54 = arith.constant 2 : index
    %58 = memref.load %arg4[%c2_54] : memref<3xf32, #tpu.memory_space<smem>>
    %59 = vector.broadcast %58 : f32 to vector<2x128xf32>
    %c2_55 = arith.constant 2 : index
    %c0_56 = arith.constant 0 : index
    %60 = memref.load %arg3[%c2_55, %c0_56] : memref<3x4xf32, #tpu.memory_space<smem>>
    %c0_57 = arith.constant 0 : index
    %c0_58 = arith.constant 0 : index
    %c0_59 = arith.constant 0 : index
    %c0_60 = arith.constant 0 : index
    %61 = vector.load %arg2[%c0_57, %c0_58, %c0_59, %c0_60] : memref<1x4x2x128xf32, #tpu.memory_space<vmem>>, vector<1x1x2x128xf32>
    %62 = vector.shape_cast %61 : vector<1x1x2x128xf32> to vector<2x128xf32>
    %63 = vector.broadcast %60 : f32 to vector<2x128xf32>
    %64 = arith.mulf %63, %62 : vector<2x128xf32>
    %65 = arith.addf %59, %64 : vector<2x128xf32>
    %c2_61 = arith.constant 2 : index
    %c1_62 = arith.constant 1 : index
    %66 = memref.load %arg3[%c2_61, %c1_62] : memref<3x4xf32, #tpu.memory_space<smem>>
    %c0_63 = arith.constant 0 : index
    %c1_64 = arith.constant 1 : index
    %c0_65 = arith.constant 0 : index
    %c0_66 = arith.constant 0 : index
    %67 = vector.load %arg2[%c0_63, %c1_64, %c0_65, %c0_66] : memref<1x4x2x128xf32, #tpu.memory_space<vmem>>, vector<1x1x2x128xf32>
    %68 = vector.shape_cast %67 : vector<1x1x2x128xf32> to vector<2x128xf32>
    %69 = vector.broadcast %66 : f32 to vector<2x128xf32>
    %70 = arith.mulf %69, %68 : vector<2x128xf32>
    %71 = arith.addf %65, %70 : vector<2x128xf32>
    %c2_67 = arith.constant 2 : index
    %c2_68 = arith.constant 2 : index
    %72 = memref.load %arg3[%c2_67, %c2_68] : memref<3x4xf32, #tpu.memory_space<smem>>
    %c0_69 = arith.constant 0 : index
    %c2_70 = arith.constant 2 : index
    %c0_71 = arith.constant 0 : index
    %c0_72 = arith.constant 0 : index
    %73 = vector.load %arg2[%c0_69, %c2_70, %c0_71, %c0_72] : memref<1x4x2x128xf32, #tpu.memory_space<vmem>>, vector<1x1x2x128xf32>
    %74 = vector.shape_cast %73 : vector<1x1x2x128xf32> to vector<2x128xf32>
    %75 = vector.broadcast %72 : f32 to vector<2x128xf32>
    %76 = arith.mulf %75, %74 : vector<2x128xf32>
    %77 = arith.addf %71, %76 : vector<2x128xf32>
    %c2_73 = arith.constant 2 : index
    %c3_74 = arith.constant 3 : index
    %78 = memref.load %arg3[%c2_73, %c3_74] : memref<3x4xf32, #tpu.memory_space<smem>>
    %c0_75 = arith.constant 0 : index
    %c3_76 = arith.constant 3 : index
    %c0_77 = arith.constant 0 : index
    %c0_78 = arith.constant 0 : index
    %79 = vector.load %arg2[%c0_75, %c3_76, %c0_77, %c0_78] : memref<1x4x2x128xf32, #tpu.memory_space<vmem>>, vector<1x1x2x128xf32>
    %80 = vector.shape_cast %79 : vector<1x1x2x128xf32> to vector<2x128xf32>
    %81 = vector.broadcast %78 : f32 to vector<2x128xf32>
    %82 = arith.mulf %81, %80 : vector<2x128xf32>
    %83 = arith.addf %77, %82 : vector<2x128xf32>
    %c0_79 = arith.constant 0 : index
    %c2_80 = arith.constant 2 : index
    %c0_81 = arith.constant 0 : index
    %c0_82 = arith.constant 0 : index
    %84 = vector.load %arg5[%c0_79, %c2_80, %c0_81, %c0_82] : memref<1x3x2x128xf32, #tpu.memory_space<vmem>>, vector<1x1x2x128xf32>
    %85 = vector.shape_cast %84 : vector<1x1x2x128xf32> to vector<2x128xf32>
    %86 = vector.shape_cast %83 : vector<2x128xf32> to vector<1x1x2x128xf32>
    tpu.vector_store %arg5[%c0_79, %c2_80, %c0_81, %c0_82], %86 {strides = array<i32>} : memref<1x3x2x128xf32, #tpu.memory_space<vmem>>, vector<1x1x2x128xf32>,
    return
  }
  func.func @transform_0(%arg0: i32, %arg1: i32) -> (i32, i32, i32, i32) {
    %c0_i32 = arith.constant 0 : i32
    %c0_i32_0 = arith.constant 0 : i32
    %c0_i32_1 = arith.constant 0 : i32
    return %arg0, %c0_i32, %arg1, %c0_i32_0 : i32, i32, i32, i32
  }
  func.func @transform_1(%arg0: i32, %arg1: i32) -> (i32, i32) {
    %c0_i32 = arith.constant 0 : i32
    %c0_i32_0 = arith.constant 0 : i32
    %c0_i32_1 = arith.constant 0 : i32
    return %c0_i32, %c0_i32_0 : i32, i32
  }
  func.func @transform_2(%arg0: i32, %arg1: i32) -> i32 {
    %c0_i32 = arith.constant 0 : i32
    %c0_i32_0 = arith.constant 0 : i32
    return %c0_i32 : i32
  }
  func.func @transform_3(%arg0: i32, %arg1: i32) -> (i32, i32, i32, i32) {
    %c0_i32 = arith.constant 0 : i32
    %c0_i32_0 = arith.constant 0 : i32
    %c0_i32_1 = arith.constant 0 : i32
    return %arg0, %c0_i32, %arg1, %c0_i32_0 : i32, i32, i32, i32
  }
}

</mosaic_0001>

<bundles_post_ra>
// kernel: tpu_custom_call.1
= control target key start
LH: loop header
LB: loop body
LE: loop exit
PB: predicated region body
PF: predicated region fallthrough
CT: control target
= control target key end

     0   :  { %s925_s0 = inlined_call_operand.hbm [shape: f32[2,4,2,128], index: 0, kind: input, shape index: {}]   ;;  %s926_s1 = inlined_call_operand.hbm [shape: f32[3,4], index: 1, kind: input, shape index: {}]   ;;  %s927_s2 = inlined_call_operand.vmem [shape: f32[3], index: 2, kind: input, shape index: {}]   ;;  %s928_s3 = inlined_call_operand.hbm [shape: f32[2,3,2,128], index: 3, kind: output, shape index: {}]  }
   0x1   :  { %929 = sst [smem:[#allocation14_spill]] %s926_s1 }
   0x2   :  { %8 = vsyncpa [#allocation3], 0 }
   0x3   :  { %10 = vsyncpa [#allocation3 + $0x1], 0 }
   0x4   :  { %11 = vsyncpa [#allocation5], 0 }
   0x5   :  { %12 = vsyncpa [#allocation6], 0 }
   0x6   :  { %13 = vsyncpa [#allocation4], 0 }
   0x7   :  { %15 = vsyncpa [#allocation4 + $0x1], 0  ;;  %s743_s12 = smov 0   ;;  %s745_s13 = smov 0  }
   0x8   :  { %s747_s14 = smov 0   ;;  %s749_s15 = smov 0  }
   0x9   :  { %s751_s16 = smov 0   ;;  %s753_s17 = smov 0  }
   0xa LB: > { %s435_s18 = sadd.s32 4294967295, %s715_s17   ;;  %s436_s19 = sadd.s32 4294967294, %s715_s17   ;;  %s715_s17 = sphi %s753_s17, %s21_s17   ;;  %s711_s16 = sphi %s751_s16, %s942_s16   ;;  %s707_s15 = sphi %s749_s15, %s941_s15   ;;  %s703_s14 = sphi %s747_s14, %s940_s14   ;;  %s699_s13 = sphi %s745_s13, %s939_s13   ;;  %s695_s12 = sphi %s743_s12, %s938_s12  }
   0xb   : > { %s42_s20 = sadd.s32 1, %s703_s14  ;;  %p49_p0 = scmp.ne.s32.totalorder %s703_s14, %s699_s13 }
   0xc   : > { %p50_p1 = scmp.eq.s32.totalorder %s715_s17, 0  ;;  %p55_p2 = scmp.ne.s32.totalorder %s699_s13, %s695_s12 }
   0xd   : > { %p781_p3 = scmp.eq.s32.totalorder %s435_s18, 0  ;;  %p123_p4 = scmp.eq.s32.totalorder %s435_s18, 1 }
   0xe   : > { %p785_p5 = por %p50_p1, %p49_p0  ;;  %p129_p6 = scmp.eq.s32.totalorder %s436_s19, 1 }
   0xf   : > { %p791_p7 = por %p781_p3, %p55_p2  ;;  %p795_p8 = por %p123_p4, %p49_p0 }
  0x10   : > { %p799_p9 = por %p129_p6, %p55_p2  ;;  %p437_p10 = scmp.ge.s32.totalorder %s715_s17, 1 }
  0x11   : > { %p136_p11 = scmp.lt.s32.totalorder %s715_s17, 3  ;;  %s935_s1 = sld [smem:[#allocation14_spill]] }
  0x12   : > { %p440_p13 = scmp.ge.s32.totalorder %s715_s17, 2  ;;  %p507_p0 = scmp.lt.s32.totalorder %s715_s17, 2 }
  0x13   : > { %p808_p12 = pnand %p437_p10, %p136_p11  ;;  %s158_s5 = sshll.u32 %s927_s2, 4  ;;  %s159_s5 = int_to_ptr.vmem [resolvable:$true] %s158_s5 }
  0x14   : > { %p821_p2 = pnand %p507_p0, %p785_p5  ;;  %s717_s7 = smov [#allocation7]  }
  0x15   : > { %p490_p1 = pneg %p808_p12  ;;  %s718_s8 = smov [#allocation8]  }
  0x16   : > { %s33_s9 = sadd.s32 1, %s711_s16  ;;  %s169_s10 = sand.u32 1, %s703_s14  }
  0x17   : > { %s148_s28 = sshll.u32 %s935_s1, 4  ;;  %p491_p4 = pnand %p490_p1, %p781_p3  ;;  %s149_s28 = int_to_ptr.hbm [resolvable:$true] %s148_s28 }
  0x18   : > { %p35_p6 = scmp.ge.s32.totalorder %s33_s9, 2  ;;  %s441_s11 = sshll.u32 %s169_s10, 3 }
  0x19   : > { %493 = dma.hbm_to_smem (!%p491_p4), %s149_s28, 64, %s717_s7, [#allocation5]  }
  0x1a   : > { %496 = dma.vmem_to_smem (!%p491_p4), %s159_s5, 16, %s718_s8, [#allocation6]  }
  0x1b   : > { %s475_s18 = sshll.u32 %s711_s16, 3  ;;  %s944_s9 = smov (%p35_p6, %s33_s9), 0 }
  0x1c   : > { %s179_s26 = scalar_lea.hbm %s925_s0, %s475_s18  ;;  %s37_s27 = ssub.s32 %s711_s16, %s944_s9 }
  0x1d   : > { %s180_s30 = sshll.u32 %s179_s26, 4  ;;  %p40_p5 = scmp.eq.s32.totalorder %s37_s27, 0  ;;  %s181_s30 = int_to_ptr.hbm [resolvable:$true] %s180_s30 }
  0x1e   : > { %s173_s28 = scalar_lea.vmem [#allocation2], %s441_s11  ;;  %s170_s7 = scalar_lea.sflag [#allocation3], %s169_s10 }
  0x1f   : > { %s182_s4 = sshll.u32 %s173_s28, 4  ;;  %s719_s8 = smov 32   ;;  %s183_s4 = int_to_ptr.vmem [resolvable:$true] %s182_s4 }
  0x20   : > { %s840_s5 = scalar_select %p40_p5, %s703_s14, %s42_s20  }
  0x21   : > { %s720_s1 = smov 2   ;;  %194 = sbr.rel (%p808_p12) target bundleno = 77 (0x4d), region = 32 }
  0x22   : > { %500 = dma.hbm_to_vmem [thread:$0]  (!%p821_p2), %s181_s30, 128, %s183_s4, %s170_s7, %s719_s8, %s719_s8, %s720_s1  }
  0x23   : > { %s847_s18 = sand.u32 (!%p808_p12), 1, %s699_s13  }
  0x24   : > { %s445_s11 = sshll.u32 (!%p808_p12), %s847_s18, 3  ;;  %s197_s19 = scalar_lea.sflag (!%p808_p12), [#allocation3], %s847_s18 }
  0x25   : > { %s851_s22 = scalar_lea.vmem (!%p808_p12), [#allocation2], %s445_s11 }
  0x26   : > { %678 = dma.done.wait (%p791_p7), %s197_s19, 128  }
  0x27   : > { %680 = vsyncadd (%p791_p7), %s197_s19, 4294967168 }
  0x28   : > { %682 = dma.done.wait (%p781_p3), [#allocation5], 64  }
  0x29   : > { %684 = vsyncadd (%p781_p3), [#allocation5], 4294967232 }
  0x2a   : > { %686 = dma.done.wait (%p781_p3), [#allocation6], 16  }
  0x2b   : > { %688 = vsyncadd (%p781_p3), [#allocation6], 4294967280 }
  0x2c   : > { %216 = sfence }
  0x2d   : > { %s235_s1 = sld [smem:[#allocation8]]  ;;  %v238_v0 = vld [vmem:[%s851_s22] sm:$0x3]  ;;  %v449_v1 = vld [vmem:[%s851_s22 + $0x2] sm:$0x3]  ;;  %s476_s4 = smul.u32 6, %s847_s18 }
  0x2e   : > { %s237_s20 = sld [smem:[#allocation7]]  ;;  %v451_v4 = vld [vmem:[%s851_s22 + $0x4] sm:$0x3]  ;;  %v453_v9 = vld [vmem:[%s851_s22 + $0x6] sm:$0x3] }
  0x2f   : > { %s448_s23 = sld [smem:[#allocation7 + $0x1]]  ;;  %v264_v13 = vld [vmem:[%s851_s22] sm:$0x3]  ;;  %v457_v14 = vld [vmem:[%s851_s22 + $0x2] sm:$0x3] }
  0x30   : > { %s450_s29 = sld [smem:[#allocation7 + $0x2]]  ;;  %v459_v19 = vld [vmem:[%s851_s22 + $0x4] sm:$0x3]  ;;  %v461_v25 = vld [vmem:[%s851_s22 + $0x6] sm:$0x3] }
  0x31   : > { %s452_s6 = sld [smem:[#allocation7 + $0x3]]  ;;  %v288_v29 = vld [vmem:[%s851_s22] sm:$0x3]  ;;  %v466_v31 = vld [vmem:[%s851_s22 + $0x2] sm:$0x3] }
  0x32   : > { %s866_s10 = sld [smem:[#allocation8 + $0x1]]  ;;  %v468_v36 = vld [vmem:[%s851_s22 + $0x4] sm:$0x3]  ;;  %v470_v42 = vld [vmem:[%s851_s22 + $0x6] sm:$0x3]  ;;  %s310_s22 = scalar_lea.sflag [#allocation4], %s847_s18 }
  0x33   : > { %s455_s26 = sld [smem:[#allocation7 + $0x80]]  ;;  %v236_v2 = vstv %s235_s1  ;;  %s477_s1 = smul.u32 6, %s707_s15 }
  0x34   : > { %v239_v3 = vstv %s237_s20  ;;  %s456_s21 = sld [smem:[#allocation7 + $0x81]]  ;;  %s234_s20 = scalar_lea.vmem [#allocation9], %s476_s4 }
  0x35   : > { %v240_v5 = vmul.f32 %v239_v3, %v238_v0  ;;  %v245_v6 = vstv %s448_s23  ;;  %s458_s27 = sld [smem:[#allocation7 + $0x82]]  ;;  %s322_s15 = scalar_lea.hbm %s928_s3, %s477_s1 }
  0x36   : > { %v246_v7 = vmul.f32 %v449_v1, %v245_v6  ;;  %v251_v8 = vstv %s450_s29  ;;  %s871_s30 = sld [smem:[#allocation7 + $0x83]] }
  0x37   : > { %v241_v10 = vadd.f32 %v240_v5, %v236_v2  ;;  %v252_v11 = vmul.f32 %v451_v4, %v251_v8  ;;  %v257_v12 = vstv %s452_s6  ;;  %s874_s28 = sld [smem:[#allocation8 + $0x2]]  ;;  %s323_s6 = sshll.u32 %s234_s20, 4  ;;  %s324_s6 = int_to_ptr.vmem [resolvable:$true] %s323_s6 }
  0x38   : > { %s464_s7 = sld [smem:[#allocation7 + $0x100]]  ;;  %v258_v16 = vmul.f32 %v453_v9, %v257_v12  ;;  %v262_v17 = vstv %s866_s10  ;;  %s325_s10 = sshll.u32 %s322_s15, 4  ;;  %s326_s10 = int_to_ptr.hbm [resolvable:$true] %s325_s10 }
  0x39   : > { %v247_v15 = vadd.f32 %v246_v7, %v241_v10  ;;  %v265_v18 = vstv %s455_s26  ;;  %s465_s8 = sld [smem:[#allocation7 + $0x101]]  ;;  %s639_s26 = sshra.s32 %s326_s10, 4  ;;  %s640_s26 = int_to_ptr.hbm [resolvable:$true] %s639_s26 }
  0x3a   : > { %v266_v20 = vmul.f32 %v265_v18, %v264_v13  ;;  %v270_v21 = vstv %s456_s21  ;;  %s467_s11 = sld [smem:[#allocation7 + $0x102]]  ;;  %s641_s21 = scalar_lea.hbm %s640_s26, 6 }
  0x3b   : > { %v253_v22 = vadd.f32 %v252_v11, %v247_v15  ;;  %v271_v23 = vmul.f32 %v457_v14, %v270_v21  ;;  %v275_v24 = vstv %s458_s27  ;;  %s469_s19 = sld [smem:[#allocation7 + $0x103]]  ;;  %p642_p3 = scmp.ne.s32.totalorder %s640_s26, %s641_s21 }
  0x3c   : > { %v267_v26 = vadd.f32 %v266_v20, %v262_v17  ;;  %v276_v27 = vmul.f32 %v459_v19, %v275_v24  ;;  %v280_v28 = vstv %s871_s30  ;;  %p646_p11 = scmp.lt.s32.totalorder %s640_s26, %s928_s3 }
  0x3d   : > { %v259_v30 = vadd.f32 %v258_v16, %v253_v22  ;;  %v281_v33 = vmul.f32 %v461_v25, %v280_v28  ;;  %v286_v34 = vstv %s874_s28  ;;  %p643_p7 = pnand %p642_p3, %p795_p8  ;;  %s645_s28 = scalar_lea.hbm %s928_s3, 12 }
  0x3e   : > { %v272_v32 = vadd.f32 %v271_v23, %v267_v26  ;;  %v289_v35 = vstv %s464_s7  ;;  %p647_p12 = scmp.lt.s32.totalorder %s645_s28, %s641_s21 }
  0x3f   : > { %260 = vst [vmem:[%s234_s20] sm:$0x3] %v259_v30  ;;  %v290_v37 = vmul.f32 %v289_v35, %v288_v29  ;;  %v294_v38 = vstv %s465_s8  ;;  %p644_p10 = pneg %p643_p7 }
  0x40   : > { %v277_v39 = vadd.f32 %v276_v27, %v272_v32  ;;  %v295_v40 = vmul.f32 %v466_v31, %v294_v38  ;;  %v299_v41 = vstv %s467_s11  ;;  %p648_p0 = por %p647_p12, %p646_p11 }
  0x41   : > { %v291_v43 = vadd.f32 %v290_v37, %v286_v34  ;;  %v300_v44 = vmul.f32 %v468_v36, %v299_v41  ;;  %v304_v45 = vstv %s469_s19 }
  0x42   : > { %v282_v46 = vadd.f32 %v281_v33, %v277_v39  ;;  %v305_v48 = vmul.f32 %v470_v42, %v304_v45  ;;  %p649_p1 = pnand %p648_p0, %p644_p10 }
  0x43   : > { %v296_v47 = vadd.f32 %v295_v40, %v291_v43 }
  0x44   : > { %462 = vst [vmem:[%s234_s20 + $0x2] sm:$0x3] %v282_v46 }
  0x45   : > { %v301_v49 = vadd.f32 %v300_v44, %v296_v47 }
  0x47   : > { %v306_v50 = vadd.f32 %v305_v48, %v301_v49 }
  0x49   : > { %471 = vst [vmem:[%s234_s20 + $0x4] sm:$0x3] %v306_v50 }
  0x4a   : > { %652 = shalt.err (!%p649_p1)
}
  0x4b   : > { %s721_s18 = smov 32   ;;  %s722_s8 = smov 2  }
  0x4c   : > { %488 = dma.vmem_to_hbm [thread:$0]  (%p795_p8), %s324_s6, 96, %s326_s10, %s310_s22, %s721_s18, %s721_s18, %s722_s8  }
  0x4d PF: > { %s340_s11 = sand.u32 1, %s695_s12   ;;  %p502_p2 = pnand %p440_p13, %p799_p9 }
  0x4e   : > { %s341_s19 = scalar_lea.sflag [#allocation4], %s340_s11 }
  0x4f   : > { %p503_p4 = pneg %p502_p2 }
  0x51   : > { %690 = dma.done.wait (%p503_p4), %s341_s19, 96  }
  0x52   : > { %692 = vsyncadd (%p503_p4), %s341_s19, 4294967200  ;;  %s21_s17 = sadd.s32 1, %s715_s17   ;;  %s938_s12 = smov %s699_s13 }
  0x53   : > { %p18_p6 = scmp.ge.s32.totalorder %s21_s17, 4   ;;  %s939_s13 = smov %s703_s14 }
  0x54   : > { %s940_s14 = smov %s840_s5  ;;  %s941_s15 = smov %s711_s16 }
  0x55   : > { %s942_s16 = smov %s944_s9  ;;  %20 = sbr.rel (!%p18_p6) target bundleno = 10 (0xa), region = 92 }
  0x5a   :  { %347 = vsyncpa [#allocation3], 1 }
  0x5b   :  { %349 = vsyncpa [#allocation3 + $0x1], 1 }
  0x5c   :  { %350 = vsyncpa [#allocation4], 1 }
  0x5d   :  { %352 = vsyncpa [#allocation4 + $0x1], 1 }
  0x5e   :  { %353 = vsyncpa [#allocation5], 1 }
  0x5f   :  { %355 = vsyncpa [#allocation5 + $0x1], 1 }
  0x60   :  { %356 = vsyncpa [#allocation6], 1 }
  0x61   :  { %358 = vsyncpa [#allocation6 + $0x1], 1 }

</bundles_post_ra>
